<compile_context>
chip_gen: v6e
topology: v6e:2x2x1
jax: 0.10.0
libtpu: 0.0.40
codegen_flags: <defaults>
</compile_context>

<pallas_src>
import functools

import jax
import jax.numpy as jnp
from jax.experimental import pallas as pl
from jax.experimental.pallas import tpu as pltpu

LANE = 128      # vreg lane width
SUBLANE = 8     # f32 sublane tiling (x tile stays f32)


def _round_up(n, m):
    return (n + m - 1) // m * m


def _cdiv(a, b):
    return -(-a // b)


# ---------------------------------------------------------------------------
# Kernel: whole 3-layer MLP for one batch tile. Weights/biases are VMEM-
# resident across grid steps (constant index_map). Input cast f32->bf16 is
# fused here; matmuls run bf16 x bf16 -> f32 on the MXU; elementwise is f32.
# ---------------------------------------------------------------------------
def mlp_kernel(x_ref, w1_ref, b1_ref, w2_ref, b2_ref, w3_ref, b3_ref, o_ref):
    x = x_ref[...].astype(w1_ref.dtype)                    # (TB, F) f32 -> bf16
    k = w1_ref.shape[0]
    if x.shape[1] != k:                                    # static; exact zero-pad
        x = jnp.pad(x, ((0, 0), (0, k - x.shape[1])))
    h1 = jnp.dot(x, w1_ref[...], preferred_element_type=jnp.float32)
    h1 = jnp.maximum(h1 + b1_ref[...], 0.0)                # f32
    h2 = jnp.dot(h1.astype(w2_ref.dtype), w2_ref[...],
                 preferred_element_type=jnp.float32)
    h2 = jnp.maximum(h2 + b2_ref[...], 0.0)                # f32
    out = jnp.dot(h2.astype(w3_ref.dtype), w3_ref[...],
                  preferred_element_type=jnp.float32)
    o_ref[...] = out + b3_ref[...]                         # (TB, out_features) f32


# ---------------------------------------------------------------------------
# One-time parameter preprocessing (off the per-forward hot path): zero-pad to
# MXU/lane-friendly shapes (exact: padded channels stay 0 through ReLU) and
# cast weights to bf16. Biases stay f32. Output dim of w3 is NOT padded.
# ---------------------------------------------------------------------------
def prepare_params(params, in_features, hidden, out_features, w_dtype=jnp.bfloat16):
    f_pad = _round_up(in_features, 16)     # bf16 K packing; not 128 (review)
    h_pad = _round_up(hidden, LANE)

    def pad2(a, rows, cols):
        return jnp.pad(a, ((0, rows - a.shape[0]), (0, cols - a.shape[1])))

    return {
        "w1": pad2(params["w1"], f_pad, h_pad).astype(w_dtype),
        "b1": pad2(params["b1"], 1, h_pad).astype(jnp.float32),
        "w2": pad2(params["w2"], h_pad, h_pad).astype(w_dtype),
        "b2": pad2(params["b2"], 1, h_pad).astype(jnp.float32),
        "w3": pad2(params["w3"], h_pad, out_features).astype(w_dtype),
        "b3": params["b3"].astype(jnp.float32),            # (1, out_features)
        "in_features": in_features,
        "out_features": out_features,
    }


def _choose_batch_tile(b, block_b):
    """Balanced batch tiling; >=2 grid steps when possible (v7x megacore)."""
    n_tiles = max(1, _cdiv(b, block_b))
    if b >= 2 * SUBLANE:
        n_tiles = max(n_tiles, 2)
    tb = _round_up(_cdiv(b, n_tiles), SUBLANE)
    if tb >= b:
        tb = b                      # single full-batch tile: block == array dim
    b_pad = _cdiv(b, tb) * tb
    return tb, b_pad


def _vmem_limit_bytes():
    """~3/4 of physical VMEM, capped at 96 MiB (v7x: ~48 MiB, v5e/v6e: 96 MiB)."""
    try:
        cap = pltpu.get_tpu_info().vmem_capacity_bytes
    except Exception:
        cap = 64 * 1024 * 1024
    return min(int(cap * 3 // 4), 96 * 1024 * 1024)


# ---------------------------------------------------------------------------
# Forward wrapper: flatten -> (row-pad batch only, if needed) -> pallas_call
# over a batch grid -> slice batch padding back off.
# ---------------------------------------------------------------------------
def dense_model_forward(x, prepped, *, block_b=4096):
    w1, b1 = prepped["w1"], prepped["b1"]
    w2, b2 = prepped["w2"], prepped["b2"]
    w3, b3 = prepped["w3"], prepped["b3"]
    out_features = prepped["out_features"]

    b = x.shape[0]
    x2d = x.reshape(b, -1)
    if x2d.dtype != jnp.float32:
        x2d = x2d.astype(jnp.float32)
    in_features = x2d.shape[1]
    assert in_features == prepped["in_features"]

    tb, b_pad = _choose_batch_tile(b, block_b)
    if b_pad != b:
        x2d = jnp.pad(x2d, ((0, b_pad - b), (0, 0)))       # rows only, stays f32

    const = lambda i: (0, 0)    # weights/biases resident across grid steps
    out = pl.pallas_call(
        mlp_kernel,
        out_shape=jax.ShapeDtypeStruct((b_pad, out_features), jnp.float32),
        grid_spec=pltpu.PrefetchScalarGridSpec(
            num_scalar_prefetch=0,
            grid=(b_pad // tb,),
            in_specs=[
                pl.BlockSpec((tb, in_features), lambda i: (i, 0)),   # x tile (f32)
                pl.BlockSpec(w1.shape, const),                       # w1
                pl.BlockSpec(b1.shape, const),                       # b1
                pl.BlockSpec(w2.shape, const),                       # w2
                pl.BlockSpec(b2.shape, const),                       # b2
                pl.BlockSpec(w3.shape, const),                       # w3 (N = out)
                pl.BlockSpec(b3.shape, const),                       # b3
            ],
            out_specs=pl.BlockSpec((tb, out_features), lambda i: (i, 0)),
        ),
        compiler_params=pltpu.CompilerParams(
            dimension_semantics=("parallel",),      # batch axis shards across TCs
            vmem_limit_bytes=_vmem_limit_bytes(),
        ),
    )(x2d, w1, b1, w2, b2, w3, b3)

    return out[:b] if b_pad != b else out


# ---------------------------------------------------------------------------
# Deterministic synthetic init (nn.Linear-like, stored transposed [in, out]).
# ---------------------------------------------------------------------------
def init_params(key, in_features, out_features, hidden=10):
    ks = jax.random.split(key, 6)

    def uniform(k, shape, fan_in):
        bound = 1.0 / jnp.sqrt(fan_in)
        return jax.random.uniform(k, shape, jnp.float32, -bound, bound)

    return {
        "w1": uniform(ks[0], (in_features, hidden), in_features),
        "b1": uniform(ks[1], (1, hidden), in_features),
        "w2": uniform(ks[2], (hidden, hidden), hidden),
        "b2": uniform(ks[3], (1, hidden), hidden),          # FIXED: was (hidden, hidden)
        "w3": uniform(ks[4], (hidden, out_features), hidden),
        "b3": uniform(ks[5], (1, out_features), hidden),
    }


if __name__ == "__main__":
    key = jax.random.PRNGKey(0)
    k_x, k_p = jax.random.split(key)

    # Small input consistent with the module: batch=2, trailing dims (4, 8)
    # -> num_flat_features = 32, outputs = 5.
    B, C, S = 2, 4, 8
    in_features = C * S
    hidden = 10
    out_features = 5

    x = jax.random.normal(k_x, (B, C, S), dtype=jnp.float32)
    params = init_params(k_p, in_features, out_features, hidden)
    prepped = prepare_params(params, in_features, hidden, out_features)

    out = dense_model_forward(x, prepped)
    out = jax.block_until_ready(out)
    assert out.shape == (B, out_features), out.shape

    # Reference in plain JAX, mirroring the kernel's bf16-input / f32-accumulate
    # numerics (HIGHEST precision so the reference matmuls are exact f32).
    x2d = x.reshape(B, -1)
    bf = lambda a: a.astype(jnp.bfloat16).astype(jnp.float32)
    mm = functools.partial(jnp.dot, precision=jax.lax.Precision.HIGHEST)
    h1 = jnp.maximum(mm(bf(x2d), bf(params["w1"])) + params["b1"], 0.0)
    h2 = jnp.maximum(mm(bf(h1), bf(params["w2"])) + params["b2"], 0.0)
    ref = mm(bf(h2), bf(params["w3"])) + params["b3"]

    assert jnp.allclose(out, ref, atol=5e-3, rtol=5e-3), (
        f"max abs err {jnp.max(jnp.abs(out - ref))}")

    print("KERNEL_OK")
</pallas_src>

<mosaic_0001>
module attributes {stable_mosaic.version = 11 : i64} {
  func.func @mlp_kernel(%arg0: i32, %arg1: memref<2x32xf32, #tpu.memory_space<vmem>>, %arg2: memref<32x128xbf16, #tpu.memory_space<vmem>>, %arg3: memref<1x128xf32, #tpu.memory_space<vmem>>, %arg4: memref<128x128xbf16, #tpu.memory_space<vmem>>, %arg5: memref<1x128xf32, #tpu.memory_space<vmem>>, %arg6: memref<128x5xbf16, #tpu.memory_space<vmem>>, %arg7: memref<1x5xf32, #tpu.memory_space<vmem>>, %arg8: memref<2x5xf32, #tpu.memory_space<vmem>>) attributes {dimension_semantics = [#tpu.dimension_semantics<parallel>], iteration_bounds = array<i64: 1>, scalar_prefetch = 0 : i64, scratch_operands = 0 : i64, tpu.core_type = #tpu.core_type<tc>, window_params = [{transform_indices = @transform_0, window_bounds = array<i64: 2, 32>}, {pipeline_mode = #tpu.pipeline_mode<synchronous>, transform_indices = @transform_1, window_bounds = array<i64: 32, 128>}, {pipeline_mode = #tpu.pipeline_mode<synchronous>, transform_indices = @transform_2, window_bounds = array<i64: 1, 128>}, {pipeline_mode = #tpu.pipeline_mode<synchronous>, transform_indices = @transform_3, window_bounds = array<i64: 128, 128>}, {pipeline_mode = #tpu.pipeline_mode<synchronous>, transform_indices = @transform_4, window_bounds = array<i64: 1, 128>}, {pipeline_mode = #tpu.pipeline_mode<synchronous>, transform_indices = @transform_5, window_bounds = array<i64: 128, 5>}, {pipeline_mode = #tpu.pipeline_mode<synchronous>, transform_indices = @transform_6, window_bounds = array<i64: 1, 5>}, {transform_indices = @transform_7, window_bounds = array<i64: 2, 5>}]} {
    %c0 = arith.constant 0 : index
    %c0_0 = arith.constant 0 : index
    %0 = vector.load %arg1[%c0, %c0_0] : memref<2x32xf32, #tpu.memory_space<vmem>>, vector<2x32xf32>
    %1 = arith.truncf %0 : vector<2x32xf32> to vector<2x32xbf16>
    %c0_1 = arith.constant 0 : index
    %c0_2 = arith.constant 0 : index
    %2 = vector.load %arg2[%c0_1, %c0_2] : memref<32x128xbf16, #tpu.memory_space<vmem>>, vector<32x128xbf16>
    %cst = arith.constant dense<0.000000e+00> : vector<2x128xf32>
    %3 = tpu.matmul %1, %2, %cst {dimension_numbers = #tpu.dot_dimension_numbers<[1], [0], [0], [1], [0, 0, 1, 1], [], []>} : vector<2x32xbf16>, vector<32x128xbf16>, vector<2x128xf32> -> vector<2x128xf32>
    %c0_3 = arith.constant 0 : index
    %c0_4 = arith.constant 0 : index
    %4 = vector.load %arg3[%c0_3, %c0_4] : memref<1x128xf32, #tpu.memory_space<vmem>>, vector<1x128xf32>
    %5 = vector.broadcast %4 : vector<1x128xf32> to vector<2x128xf32>
    %6 = arith.addf %3, %5 : vector<2x128xf32>
    %cst_5 = arith.constant 0.000000e+00 : f32
    %7 = vector.broadcast %cst_5 : f32 to vector<2x128xf32>
    %8 = arith.maximumf %6, %7 : vector<2x128xf32>
    %9 = arith.truncf %8 : vector<2x128xf32> to vector<2x128xbf16>
    %c0_6 = arith.constant 0 : index
    %c0_7 = arith.constant 0 : index
    %10 = vector.load %arg4[%c0_6, %c0_7] : memref<128x128xbf16, #tpu.memory_space<vmem>>, vector<128x128xbf16>
    %cst_8 = arith.constant dense<0.000000e+00> : vector<2x128xf32>
    %11 = tpu.matmul %9, %10, %cst_8 {dimension_numbers = #tpu.dot_dimension_numbers<[1], [0], [0], [1], [0, 0, 1, 1], [], []>} : vector<2x128xbf16>, vector<128x128xbf16>, vector<2x128xf32> -> vector<2x128xf32>
    %c0_9 = arith.constant 0 : index
    %c0_10 = arith.constant 0 : index
    %12 = vector.load %arg5[%c0_9, %c0_10] : memref<1x128xf32, #tpu.memory_space<vmem>>, vector<1x128xf32>
    %13 = vector.broadcast %12 : vector<1x128xf32> to vector<2x128xf32>
    %14 = arith.addf %11, %13 : vector<2x128xf32>
    %cst_11 = arith.constant 0.000000e+00 : f32
    %15 = vector.broadcast %cst_11 : f32 to vector<2x128xf32>
    %16 = arith.maximumf %14, %15 : vector<2x128xf32>
    %17 = arith.truncf %16 : vector<2x128xf32> to vector<2x128xbf16>
    %c0_12 = arith.constant 0 : index
    %c0_13 = arith.constant 0 : index
    %18 = vector.load %arg6[%c0_12, %c0_13] : memref<128x5xbf16, #tpu.memory_space<vmem>>, vector<128x5xbf16>
    %cst_14 = arith.constant dense<0.000000e+00> : vector<2x5xf32>
    %19 = tpu.matmul %17, %18, %cst_14 {dimension_numbers = #tpu.dot_dimension_numbers<[1], [0], [0], [1], [0, 0, 1, 1], [], []>} : vector<2x128xbf16>, vector<128x5xbf16>, vector<2x5xf32> -> vector<2x5xf32>
    %c0_15 = arith.constant 0 : index
    %c0_16 = arith.constant 0 : index
    %20 = vector.load %arg7[%c0_15, %c0_16] : memref<1x5xf32, #tpu.memory_space<vmem>>, vector<1x5xf32>
    %21 = vector.broadcast %20 : vector<1x5xf32> to vector<2x5xf32>
    %22 = arith.addf %19, %21 : vector<2x5xf32>
    %c0_17 = arith.constant 0 : index
    %c0_18 = arith.constant 0 : index
    %23 = vector.load %arg8[%c0_17, %c0_18] : memref<2x5xf32, #tpu.memory_space<vmem>>, vector<2x5xf32>
    tpu.vector_store %arg8[%c0_17, %c0_18], %22 {strides = array<i32>} : memref<2x5xf32, #tpu.memory_space<vmem>>, vector<2x5xf32>,
    return
  }
  func.func @transform_0(%arg0: i32) -> (i32, i32) {
    %c0_i32 = arith.constant 0 : i32
    %c0_i32_0 = arith.constant 0 : i32
    return %arg0, %c0_i32 : i32, i32
  }
  func.func @transform_1(%arg0: i32) -> (i32, i32) {
    %c0_i32 = arith.constant 0 : i32
    %c0_i32_0 = arith.constant 0 : i32
    %c0_i32_1 = arith.constant 0 : i32
    return %c0_i32, %c0_i32_0 : i32, i32
  }
  func.func @transform_2(%arg0: i32) -> (i32, i32) {
    %c0_i32 = arith.constant 0 : i32
    %c0_i32_0 = arith.constant 0 : i32
    %c0_i32_1 = arith.constant 0 : i32
    return %c0_i32, %c0_i32_0 : i32, i32
  }
  func.func @transform_3(%arg0: i32) -> (i32, i32) {
    %c0_i32 = arith.constant 0 : i32
    %c0_i32_0 = arith.constant 0 : i32
    %c0_i32_1 = arith.constant 0 : i32
    return %c0_i32, %c0_i32_0 : i32, i32
  }
  func.func @transform_4(%arg0: i32) -> (i32, i32) {
    %c0_i32 = arith.constant 0 : i32
    %c0_i32_0 = arith.constant 0 : i32
    %c0_i32_1 = arith.constant 0 : i32
    return %c0_i32, %c0_i32_0 : i32, i32
  }
  func.func @transform_5(%arg0: i32) -> (i32, i32) {
    %c0_i32 = arith.constant 0 : i32
    %c0_i32_0 = arith.constant 0 : i32
    %c0_i32_1 = arith.constant 0 : i32
    return %c0_i32, %c0_i32_0 : i32, i32
  }
  func.func @transform_6(%arg0: i32) -> (i32, i32) {
    %c0_i32 = arith.constant 0 : i32
    %c0_i32_0 = arith.constant 0 : i32
    %c0_i32_1 = arith.constant 0 : i32
    return %c0_i32, %c0_i32_0 : i32, i32
  }
  func.func @transform_7(%arg0: i32) -> (i32, i32) {
    %c0_i32 = arith.constant 0 : i32
    %c0_i32_0 = arith.constant 0 : i32
    return %arg0, %c0_i32 : i32, i32
  }
}

</mosaic_0001>

<bundles_post_ra>
// kernel: tpu_custom_call.1
= control target key start
LH: loop header
LB: loop body
LE: loop exit
PB: predicated region body
PF: predicated region fallthrough
CT: control target
= control target key end

     0   :  { %12 = vsyncpa [#allocation3], 0  ;;  %s649_s0 = inlined_call_operand.vmem [shape: f32[2,32], index: 0, kind: input, shape index: {}]   ;;  %s650_s1 = inlined_call_operand.hbm [shape: bf16[32,128], index: 1, kind: input, shape index: {}]   ;;  %s651_s2 = inlined_call_operand.vmem [shape: f32[1,128], index: 2, kind: input, shape index: {}]   ;;  %s652_s3 = inlined_call_operand.vmem [shape: bf16[128,128], index: 3, kind: input, shape index: {}]   ;;  %s653_s4 = inlined_call_operand.vmem [shape: f32[1,128], index: 4, kind: input, shape index: {}]   ;;  %s654_s5 = inlined_call_operand.vmem [shape: bf16[128,5], index: 5, kind: input, shape index: {}]   ;;  %s655_s6 = inlined_call_operand.vmem [shape: f32[1,5], index: 6, kind: input, shape index: {}]   ;;  %s656_s7 = inlined_call_operand.hbm [shape: f32[2,5], index: 7, kind: output, shape index: {}]  }
   0x1   :  { %13 = vsyncpa [#allocation4], 0  ;;  %s513_s24 = smov [#allocation2]  }
   0x2   :  { %s21_s25 = sshll.u32 %s513_s24, 4  ;;  %s22_s25 = int_to_ptr.vmem [resolvable:$true] %s21_s25 }
   0x3   :  { %s477_s26 = scalar_lea.vmem %s22_s25, 256  ;;  %p482_p1 = scmp.lt.s32.totalorder %s22_s25, %s22_s25 }
   0x4   :  { %p478_p0 = scmp.ne.s32.totalorder %s22_s25, %s477_s26  ;;  %p483_p2 = scmp.lt.s32.totalorder %s477_s26, %s477_s26 }
   0x6   :  { %p484_p3 = por %p483_p2, %p482_p1 }
   0x8   :  { %p485_p4 = pnand %p484_p3, %p478_p0 }
   0xa   :  { %488 = shalt.err (!%p485_p4)
}
   0xb   :  { %s514_s27 = smov 64   ;;  %s515_s28 = smov 4  }
   0xc   :  { %27 = dma.hbm_to_vmem [thread:$0]  %s650_s1, 256, %s22_s25, [#allocation3], %s514_s27, %s514_s27, %s515_s28  }
   0xd   :  { %509 = dma.done.wait [#allocation3], 256  }
   0xe   :  { %510 = vsyncadd [#allocation3], 4294967040  ;;  %v516_v0 = vmov 0.0   ;;  %vm517_vm0 = vmmov 0   ;;  %v451_v1 = vld [vmem:[#allocation2 + $0x8] sm:$0xff]   ;;  %v452_v2 = vld [vmem:[#allocation2] sm:$0xff]  }
   0xf   :  { %397 = vmatprep.subr.bf16.mxu0 %v516_v0  ;;  %401 = vmatprep.mubr.msk.bf16.mxu0 %vm517_vm0, %v516_v0  ;;  %v42_v3 = vld [vmem:[%s649_s0] sm:$0x3]  ;;  %v453_v4 = vld [vmem:[%s652_s3 + $0x38] sm:$0xff]   ;;  %v454_v6 = vld [vmem:[%s652_s3 + $0x30] sm:$0xff]   ;;  %vm67_vm1 = vcmask 261120   ;;  %s518_s19 = smov [#allocation5]  }
  0x10   :  { %405 = vmatprep.subr.bf16.mxu1 %v516_v0  ;;  %421 = vmatprep.mubr.msk.bf16.mxu1 %vm517_vm0, %v516_v0  ;;  %v43_v5 = vpack.c.bf16 %v42_v3, %v42_v3  ;;  %v455_v7 = vld [vmem:[%s652_s3 + $0x28] sm:$0xff]   ;;  %v456_v8 = vld [vmem:[%s652_s3 + $0x20] sm:$0xff]   ;;  %v457_v9 = vld [vmem:[%s652_s3 + $0x18] sm:$0xff]   ;;  %s345_s20 = sshll.u32 %s518_s19, 4  ;;  %vm337_vm2 = vcmask 33792   ;;  %s346_s20 = int_to_ptr.vmem [resolvable:$true] %s345_s20 }
  0x11   :  { %398 = vmatpush3.bf16.msra.mxu0 %v451_v1  ;;  %406 = vmatpush3.bf16.msra.mxu1 %v453_v4  ;;  %v458_v10 = vld [vmem:[%s652_s3 + $0x10] sm:$0xff]   ;;  %v459_v11 = vld [vmem:[%s652_s3 + $0x8] sm:$0xff]   ;;  %v460_v12 = vld [vmem:[%s652_s3] sm:$0xff]   ;;  %p494_p6 = scmp.lt.s32.totalorder %s346_s20, %s346_s20 }
  0x12   :  { %399 = vmatprep.subr.bf16.mxu0 %v516_v0  ;;  %407 = vmatprep.subr.bf16.mxu1 %v516_v0  ;;  %v461_v13 = vld [vmem:[%s654_s5 + $0x38] sm:$0xff]   ;;  %v462_v14 = vld [vmem:[%s654_s5 + $0x30] sm:$0xff]   ;;  %v463_v15 = vld [vmem:[%s654_s5 + $0x28] sm:$0xff]  }
  0x13   :  { %v464_v16 = vld [vmem:[%s654_s5 + $0x20] sm:$0xff]   ;;  %v465_v17 = vld [vmem:[%s654_s5 + $0x18] sm:$0xff]   ;;  %v466_v18 = vld [vmem:[%s654_s5 + $0x10] sm:$0xff]  }
  0x14   :  { %v354_v19 = vld [vmem:[%s651_s2] ss:$0 sm:$0xff]  ;;  %v467_v27 = vld [vmem:[%s654_s5 + $0x8] sm:$0xff]  }
  0x15   :  { %400 = vmatpush3.bf16.msra.mxu0 %v452_v2  ;;  %408 = vmatpush3.bf16.msra.mxu1 %v454_v6  ;;  %v468_v28 = vld [vmem:[%s654_s5] sm:$0xff]  }
  0x16   :  { %425 = vmatprep.subr.bf16.mxu0 %v516_v0  ;;  %409 = vmatprep.subr.bf16.mxu1 %v516_v0  ;;  %v358_v29 = vld [vmem:[%s653_s4] ss:$0 sm:$0xff]  ;;  %s489_s4 = scalar_lea.vmem %s346_s20, 32 }
  0x17   :  { %v367_v37 = vld [vmem:[%s655_s6] ss:$0 sm:$0xff]  ;;  %p490_p5 = scmp.ne.s32.totalorder %s346_s20, %s489_s4  ;;  %p495_p7 = scmp.lt.s32.totalorder %s489_s4, %s489_s4 }
  0x18   :  { %402 = vmatmul.mubr.msk.bf16.vlgmr.msra.gmra.mxu0 %vm67_vm1, %v43_v5 }
  0x19   :  { %441 = vmatprep.mubr.msk.bf16.mxu0 %vm517_vm0, %v516_v0  ;;  %410 = vmatpush3.bf16.msra.mxu1 %v455_v7  ;;  %p496_p8 = por %p495_p7, %p494_p6 }
  0x1a   :  { %411 = vmatprep.subr.bf16.mxu1 %v516_v0  ;;  %426 = vmatpush3.bf16.msra.mxu0 %v461_v13 }
  0x1b   :  { %427 = vmatprep.subr.bf16.mxu0 %v516_v0  ;;  %p497_p9 = pnand %p496_p8, %p490_p5 }
  0x1d   :  { %412 = vmatpush3.bf16.msra.mxu1 %v456_v8 }
  0x1e   :  { %413 = vmatprep.subr.bf16.mxu1 %v516_v0  ;;  %428 = vmatpush3.bf16.msra.mxu0 %v462_v14 }
  0x1f   :  { %429 = vmatprep.subr.bf16.mxu0 %v516_v0 }
  0x21   :  { %414 = vmatpush3.bf16.msra.mxu1 %v457_v9 }
  0x22   :  { %415 = vmatprep.subr.bf16.mxu1 %v516_v0  ;;  %430 = vmatpush3.bf16.msra.mxu0 %v463_v15 }
  0x23   :  { %431 = vmatprep.subr.bf16.mxu0 %v516_v0 }
  0x25   :  { %416 = vmatpush3.bf16.msra.mxu1 %v458_v10 }
  0x26   :  { %417 = vmatprep.subr.bf16.mxu1 %v516_v0  ;;  %432 = vmatpush3.bf16.msra.mxu0 %v464_v16 }
  0x27   :  { %433 = vmatprep.subr.bf16.mxu0 %v516_v0 }
  0x29   :  { %418 = vmatpush3.bf16.msra.mxu1 %v459_v11 }
  0x2a   :  { %419 = vmatprep.subr.bf16.mxu1 %v516_v0  ;;  %434 = vmatpush3.bf16.msra.mxu0 %v465_v17 }
  0x2b   :  { %435 = vmatprep.subr.bf16.mxu0 %v516_v0 }
  0x2d   :  { %420 = vmatpush3.bf16.msra.mxu1 %v460_v12 }
  0x2e   :  { %436 = vmatpush3.bf16.msra.mxu0 %v466_v18 }
  0x2f   :  { %437 = vmatprep.subr.bf16.mxu0 %v516_v0 }
  0x32   :  { %438 = vmatpush3.bf16.msra.mxu0 %v467_v27 }
  0x33   :  { %439 = vmatprep.subr.bf16.mxu0 %v516_v0 }
  0x36   :  { %440 = vmatpush3.bf16.msra.mxu0 %v468_v28 }
  0xd8   :  { %v105_v20 = vpop.f32.mrf.mxu0 }
  0xd9   :  { %v106_v21 = vadd.f32 %v354_v19, %v105_v20 }
  0xda   :  { %v403_v22 = vpop.f32.mrf.mxu0 }
  0xdb   :  { %v111_v23 = vmax.f32 %v106_v21, 0.0 }
  0xdc   :  { %v108_v24 = vpop.f32.mrf.mxu0 }
  0xdd   :  { %v112_v25 = vpack.c.bf16 %v111_v23, %v111_v23 }
  0xde   :  { %v404_v26 = vpop.f32.mrf.mxu0 }
  0xdf   :  { %422 = vmatmul.mubr.bf16.vlgmr.msra.gmra.mxu1 %v112_v25 }
 0x19f   :  { %v218_v30 = vpop.f32.mrf.mxu1 }
 0x1a0   :  { %v219_v31 = vadd.f32 %v358_v29, %v218_v30 }
 0x1a1   :  { %v423_v32 = vpop.f32.mrf.mxu1 }
 0x1a2   :  { %v224_v33 = vmax.f32 %v219_v31, 0.0 }
 0x1a3   :  { %v221_v34 = vpop.f32.mrf.mxu1 }
 0x1a4   :  { %v225_v35 = vpack.c.bf16 %v224_v33, %v224_v33 }
 0x1a5   :  { %v424_v36 = vpop.f32.mrf.mxu1 }
 0x1a6   :  { %442 = vmatmul.mubr.bf16.vlgmr.msra.gmra.mxu0 %v225_v35 }
 0x266   :  { %v331_v38 = vpop.f32.mrf.mxu0 }
 0x267   :  { %v332_v39 = vadd.f32 %v367_v37, %v331_v38 }
 0x268   :  { %v443_v40 = vpop.f32.mrf.mxu0 }
 0x269   :  { %338 = vst.msk [vmem:[#allocation5] sm:$0x3] %vm337_vm2, %v332_v39 }
 0x26a   :  { %v334_v41 = vpop.f32.mrf.mxu0 }
 0x26b   :  { %500 = shalt.err (!%p497_p9)
}
 0x26c   :  { %348 = dma.vmem_to_hbm [thread:$0]  %s346_s20, 32, %s656_s7, [#allocation4]   ;;  %v444_v42 = vpop.f32.mrf.mxu0 }
 0x26d   :  { %511 = dma.done.wait [#allocation4], 32  }
 0x26e   :  { %512 = vsyncadd [#allocation4], 4294967264 }
 0x26f   :  { %352 = vsyncpa [#allocation3], 1 }
 0x270   :  { %353 = vsyncpa [#allocation4], 1 }

</bundles_post_ra>
